<compile_context>
chip_gen: v6e
topology: v6e:2x2x1
jax: 0.10.0
libtpu: 0.0.40
codegen_flags: <defaults>
</compile_context>

<pallas_src>
import jax
import jax.numpy as jnp
from jax.experimental import pallas as pl
from jax.experimental.pallas import tpu as pltpu


# ---------------------------------------------------------------------------
# Kernel bodies
# ---------------------------------------------------------------------------

def _merge_copy_kernel(x_ref, o_ref):
    """Window-reverse, no width crop.

    x_ref block: (1, T, Gw, ws, ws, d)   -- T window-rows, Gw windows each
    o_ref block: (1, T*ws, Gw, ws, d)    -- view of (B, H', W, d) with W = Gw*ws
    """
    T = x_ref.shape[1]
    Gw = x_ref.shape[2]
    ws = x_ref.shape[3]

    @pl.loop(0, T)
    def _(t):
        r0 = pl.multiple_of(t * ws, ws)
        for g in range(Gw):  # static unroll; Gw is small
            # Whole trailing (ws, d) tiles moved per statement -> copy-free.
            o_ref[0, pl.ds(r0, ws), g, :, :] = x_ref[0, t, g, :, :, :]


def _merge_column_kernel(x_ref, o_ref):
    """Window-reverse with trailing width crop; one window COLUMN per grid step.

    x_ref block: (1, T, 1, ws, ws, d)
    o_ref block: (1, T*ws, ws, d)        -- placed at w-offset g*ws inside
                                            (B, H', W', d); partial last column
                                            is clipped by Pallas writeback.
    """
    T = x_ref.shape[1]
    ws = x_ref.shape[3]

    @pl.loop(0, T)
    def _(t):
        r0 = pl.multiple_of(t * ws, ws)
        o_ref[0, pl.ds(r0, ws), :, :] = x_ref[0, t, 0, :, :, :]


def _merge_crop_fallback_kernel(x_ref, o_ref):
    """Width-crop fallback for ws not a multiple of the sublane tile (e.g. ws=7).

    x_ref block: (1, T, Gw, ws, ws, d)
    o_ref block: (1, T*ws, Wc, d)        -- Wc = Gw*ws - crop_w (trailing crop)
    """
    T = x_ref.shape[1]
    Gw = x_ref.shape[2]
    ws = x_ref.shape[3]
    Wc = o_ref.shape[2]

    @pl.loop(0, T)
    def _(t):
        r0 = pl.multiple_of(t * ws, ws)
        for g in range(Gw):  # static unroll; Gw is small
            w0 = g * ws
            cols = min(ws, Wc - w0)  # python int (trace time)
            if cols <= 0:
                break
            # TODO(synk): when ws % sublane_tile != 0 these stores are sublane
            # shifted / masked; expected to hide under the HBM DMA (kernel is
            # memory-bound) -- confirm with a bundle dump for ws=7 on v5e.
            o_ref[0, pl.ds(r0, ws), w0:w0 + cols, :] = x_ref[0, t, g, :, :cols, :]


# ---------------------------------------------------------------------------
# Sizing helpers (generation- and dtype-aware)
# ---------------------------------------------------------------------------

def _round_up(x, m):
    return ((x + m - 1) // m) * m


def _sublane_multiple(dtype):
    """Sublane pad multiple: 8 for 4-byte, 16 for 2-byte, 32 for 1-byte dtypes."""
    itemsize = jnp.dtype(dtype).itemsize
    return 8 * max(1, 4 // max(1, itemsize))


def _tpu_budgets():
    """(target_input_block_bytes, vmem_budget_bytes, vmem_capacity_bytes)."""
    vmem_cap = 64 << 20  # conservative default (v7x-class)
    try:
        info = pltpu.get_tpu_info()
        vmem_cap = int(getattr(info, "vmem_capacity_bytes", vmem_cap))
    except Exception:
        pass
    if vmem_cap <= (64 << 20):
        # v7x-class: 64 MiB physical per TC -> smaller blocks, tight cap.
        return 8 << 20, 48 << 20, vmem_cap
    # v5e / v6e: 128 MiB VMEM -> big blocks, generous cap.
    return 16 << 20, 96 << 20, vmem_cap


# ---------------------------------------------------------------------------
# Wrapper
# ---------------------------------------------------------------------------

def window_merge(x6, group_size, crop_h=0, crop_w=0, rows_per_step=None,
                 crop_impl="auto"):
    """Fused window-reverse + trailing crop.

    x6: (B, Gh, Gw, ws, ws, d) -> (B, Gh*ws - crop_h, Gw*ws - crop_w, d)
    crop_h / crop_w are removed from the END of the spatial dims (the padding
    layout GroupPadder produces).

    crop_impl: "auto" | "column" | "fallback" -- selects the crop_w>0 kernel.
    """
    B, Gh, Gw, ws_r, ws_c, d = x6.shape
    ws = int(group_size)
    assert ws_r == ws and ws_c == ws, "window dims must equal group_size"
    H, W = Gh * ws, Gw * ws
    crop_h, crop_w = int(crop_h), int(crop_w)
    assert 0 <= crop_h < H and 0 <= crop_w < W
    Hc, Wc = H - crop_h, W - crop_w

    dtype = x6.dtype
    itemsize = jnp.dtype(dtype).itemsize
    sub = _sublane_multiple(dtype)
    ws_pad = _round_up(ws, sub)
    d_pad = _round_up(d, 128)

    target_bytes, vmem_budget, vmem_cap = _tpu_budgets()

    # Window-rows that contribute output rows (fully-cropped trailing rows skipped).
    Gh_c = pl.cdiv(Hc, ws)

    use_column_grid = (crop_w > 0 and
                       (crop_impl == "column" or
                        (crop_impl == "auto" and ws % sub == 0)))

    # Padded VMEM bytes per window-row of input per grid step.
    if crop_w > 0 and use_column_grid:
        bytes_per_wrow = ws * ws_pad * d_pad * itemsize          # one window column
    else:
        bytes_per_wrow = Gw * ws * ws_pad * d_pad * itemsize     # whole window row

    if rows_per_step is not None:
        T = max(1, min(Gh_c, int(rows_per_step)))
    else:
        T = max(1, target_bytes // max(1, bytes_per_wrow))
        T = min(T, Gh_c)
    # 2x(in) + 2x(out) double-buffers must fit the per-generation VMEM budget.
    T = max(1, min(T, (vmem_budget // 4) // max(1, bytes_per_wrow)))

    # Guarantee >= 2 grid steps on parallel axes so both v7x TCs get work.
    if rows_per_step is None:
        other_parallel = B * (pl.cdiv(Wc, ws) if (crop_w > 0 and use_column_grid) else 1)
        if other_parallel < 2 and Gh_c >= 2:
            T = max(1, min(T, pl.cdiv(Gh_c, 2)))

    n_th = pl.cdiv(Gh_c, T)
    need = 4 * T * bytes_per_wrow + (4 << 20)
    vmem_limit = int(min(max(32 << 20, need), vmem_cap))

    if crop_w == 0:
        # Lane/sublane layout identical on both sides -> pure contiguous copy.
        in_spec = pl.BlockSpec((1, T, Gw, ws, ws, d),
                               lambda b, t: (b, t, 0, 0, 0, 0))
        out_spec = pl.BlockSpec((1, T * ws, Gw, ws, d),
                                lambda b, t: (b, t, 0, 0, 0))
        y = pl.pallas_call(
            _merge_copy_kernel,
            out_shape=jax.ShapeDtypeStruct((B, Hc, Gw, ws, d), dtype),
            grid_spec=pltpu.PrefetchScalarGridSpec(
                num_scalar_prefetch=0,
                grid=(B, n_th),
                in_specs=[in_spec],
                out_specs=out_spec),
            compiler_params=pltpu.CompilerParams(
                dimension_semantics=("parallel", "parallel"),
                vmem_limit_bytes=vmem_limit),
        )(x6)
        # (B, Hc, Gw, ws, d) -> (B, Hc, W, d): free metadata reshape.
        return y.reshape(B, Hc, W, d)

    if use_column_grid:
        # One window column per grid step, written straight into the cropped
        # output; the partial last column is clipped by Pallas writeback, so
        # there are no misaligned / masked stores in the kernel body.
        n_gw = pl.cdiv(Wc, ws)
        in_spec = pl.BlockSpec((1, T, 1, ws, ws, d),
                               lambda b, t, g: (b, t, g, 0, 0, 0))
        out_spec = pl.BlockSpec((1, T * ws, ws, d),
                                lambda b, t, g: (b, t, g, 0))
        return pl.pallas_call(
            _merge_column_kernel,
            out_shape=jax.ShapeDtypeStruct((B, Hc, Wc, d), dtype),
            grid_spec=pltpu.PrefetchScalarGridSpec(
                num_scalar_prefetch=0,
                grid=(B, n_th, n_gw),
                in_specs=[in_spec],
                out_specs=out_spec),
            compiler_params=pltpu.CompilerParams(
                dimension_semantics=("parallel", "parallel", "parallel"),
                vmem_limit_bytes=vmem_limit),
        )(x6)

    # Fallback: full-width cropped output block, per-column stores inside the
    # kernel (needed when ws is not a multiple of the sublane tile, e.g. ws=7).
    in_spec = pl.BlockSpec((1, T, Gw, ws, ws, d),
                           lambda b, t: (b, t, 0, 0, 0, 0))
    out_spec = pl.BlockSpec((1, T * ws, Wc, d),
                            lambda b, t: (b, t, 0, 0))
    return pl.pallas_call(
        _merge_crop_fallback_kernel,
        out_shape=jax.ShapeDtypeStruct((B, Hc, Wc, d), dtype),
        grid_spec=pltpu.PrefetchScalarGridSpec(
            num_scalar_prefetch=0,
            grid=(B, n_th),
            in_specs=[in_spec],
            out_specs=out_spec),
        compiler_params=pltpu.CompilerParams(
            dimension_semantics=("parallel", "parallel"),
            vmem_limit_bytes=vmem_limit),
    )(x6)


def group_merger_forward(x, ps, pd, group_size, rows_per_step=None,
                         crop_impl="auto"):
    """Full GroupMerger.forward.

    x  : (B*Gh*Gw, ws*ws, d)                         packed windowed tokens
    ps : [(B, Gh, Gw)]                               packed-shape metadata
    pd : ((ph_before, ph_after), (pw_before, pw_after)) padding applied upstream
    """
    (lead_shape,) = ps
    B, Gh, Gw = lead_shape
    n, d = x.shape[-2:]
    ws = group_size
    assert n == ws * ws, "token dim must be group_size**2 (2D spatial case)"

    # unpack + window split: pure metadata reshape, stays in JAX (free).
    x6 = x.reshape(B, Gh, Gw, ws, ws, d)

    (ph0, ph1), (pw0, pw1) = pd
    if ph0 == 0 and pw0 == 0:
        # GroupPadder only pads at the end -> trailing crop, fused into the kernel.
        return window_merge(x6, ws, crop_h=ph1, crop_w=pw1,
                            rows_per_step=rows_per_step, crop_impl=crop_impl)

    # TODO(synk): leading ("before") crops never occur with GroupPadder; fall back
    # to an un-fused merge + slice (one extra pass) rather than faking a fused path.
    y = window_merge(x6, ws, crop_h=0, crop_w=0, rows_per_step=rows_per_step)
    H, W = Gh * ws, Gw * ws
    return y[:, ph0:H - ph1, pw0:W - pw1, :]


# ---------------------------------------------------------------------------
# Pure-JAX reference
# ---------------------------------------------------------------------------

def _reference_forward(x, ps, pd, group_size):
    (lead_shape,) = ps
    B, Gh, Gw = lead_shape
    ws = group_size
    n, d = x.shape[-2:]
    y = x.reshape(B, Gh, Gw, ws, ws, d)
    y = jnp.transpose(y, (0, 1, 3, 2, 4, 5)).reshape(B, Gh * ws, Gw * ws, d)
    (ph0, ph1), (pw0, pw1) = pd
    return y[:, ph0:y.shape[1] - ph1, pw0:y.shape[2] - pw1, :]


# ---------------------------------------------------------------------------
# Demo / correctness check
# ---------------------------------------------------------------------------

if __name__ == "__main__":
    key = jax.random.PRNGKey(0)

    # (B, Gh, Gw, ws, d, pd, rows_per_step, crop_impl, dtype)
    cases = [
        # trailing H+W crop, ws aligned -> fused column-grid crop kernel
        (2, 2, 3, 8, 32, ((0, 1), (0, 2)), None, "auto", jnp.float32),
        # trailing H crop only, T=2 so the last tile is partial (clipping path)
        (2, 3, 2, 8, 32, ((0, 2), (0, 0)), 2, "auto", jnp.float32),
        # no crop -> plain fused copy path
        (2, 2, 2, 8, 32, ((0, 0), (0, 0)), None, "auto", jnp.float32),
        # leading crop (never produced by GroupPadder) -> un-fused fallback path
        (1, 2, 2, 8, 32, ((1, 0), (0, 1)), None, "auto", jnp.float32),
        # trailing crop forced through the per-column-store fallback kernel
        (2, 2, 3, 8, 32, ((0, 1), (0, 2)), None, "fallback", jnp.float32),
        # ws=7, no crop, B=1 -> exercises >=2-grid-step rule + non-8 window dims
        (1, 2, 2, 7, 32, ((0, 0), (0, 0)), None, "auto", jnp.float32),
        # bf16, trailing H crop -> dtype-aware sublane math, copy path
        (2, 2, 2, 8, 32, ((0, 1), (0, 0)), None, "auto", jnp.bfloat16),
    ]

    for idx, (B, Gh, Gw, ws, d, pd, rps, impl, dt) in enumerate(cases):
        key, sub = jax.random.split(key)
        ps = [(B, Gh, Gw)]
        x = jax.random.normal(sub, (B * Gh * Gw, ws * ws, d), dtype=jnp.float32)
        x = x.astype(dt)

        out = group_merger_forward(x, ps, pd, ws, rows_per_step=rps,
                                   crop_impl=impl)
        out = jax.block_until_ready(out)

        ref = _reference_forward(x, ps, pd, ws)
        assert out.shape == ref.shape, (idx, out.shape, ref.shape)
        assert jnp.array_equal(out, ref), f"Pallas GroupMerger mismatch in case {idx}"

    print("KERNEL_OK")
</pallas_src>

<mosaic_0001>
module attributes {stable_mosaic.version = 11 : i64} {
  func.func @_merge_column_kernel(%arg0: i32, %arg1: i32, %arg2: i32, %arg3: memref<1x2x1x8x8x32xf32, #tpu.memory_space<vmem>>, %arg4: memref<1x16x8x32xf32, #tpu.memory_space<vmem>>) attributes {dimension_semantics = [#tpu.dimension_semantics<parallel>, #tpu.dimension_semantics<parallel>, #tpu.dimension_semantics<parallel>], iteration_bounds = array<i64: 2, 1, 3>, scalar_prefetch = 0 : i64, scratch_operands = 0 : i64, tpu.core_type = #tpu.core_type<tc>, window_params = [{transform_indices = @transform_0, window_bounds = array<i64: 1, 2, 1, 8, 8, 32>}, {transform_indices = @transform_1, window_bounds = array<i64: 1, 16, 8, 32>}]} {
    %c0_i32 = arith.constant 0 : i32
    %c2_i32 = arith.constant 2 : i32
    %0 = arith.addi %c0_i32, %c2_i32 : i32
    %c1_i32 = arith.constant 1 : i32
    scf.for %arg5 = %c0_i32 to %0 step %c1_i32  : i32 {
      %c1_i32_1 = arith.constant 1 : i32
      %1 = arith.muli %arg5, %c1_i32_1 : i32
      %c0_i32_2 = arith.constant 0 : i32
      %2 = arith.addi %c0_i32_2, %1 : i32
      %c8_i32 = arith.constant 8 : i32
      %3 = arith.muli %2, %c8_i32 : i32
      %4 = tpu.assume_multiple %3, 8 : i32
      %c0 = arith.constant 0 : index
      %5 = arith.index_cast %2 : i32 to index
      %c0_3 = arith.constant 0 : index
      %c0_4 = arith.constant 0 : index
      %c0_5 = arith.constant 0 : index
      %c0_6 = arith.constant 0 : index
      %6 = vector.load %arg3[%c0, %5, %c0_3, %c0_4, %c0_5, %c0_6] : memref<1x2x1x8x8x32xf32, #tpu.memory_space<vmem>>, vector<1x1x1x8x8x32xf32>
      %7 = vector.shape_cast %6 : vector<1x1x1x8x8x32xf32> to vector<8x8x32xf32>
      %c0_7 = arith.constant 0 : index
      %8 = arith.index_cast %4 : i32 to index
      %c0_8 = arith.constant 0 : index
      %c0_9 = arith.constant 0 : index
      %9 = vector.load %arg4[%c0_7, %8, %c0_8, %c0_9] : memref<1x16x8x32xf32, #tpu.memory_space<vmem>>, vector<1x8x8x32xf32>
      %10 = vector.shape_cast %9 : vector<1x8x8x32xf32> to vector<8x8x32xf32>
      %11 = vector.shape_cast %7 : vector<8x8x32xf32> to vector<1x8x8x32xf32>
      tpu.vector_store %arg4[%c0_7, %8, %c0_8, %c0_9], %11 {strides = array<i32>} : memref<1x16x8x32xf32, #tpu.memory_space<vmem>>, vector<1x8x8x32xf32>,
    }
    %c2_i32_0 = arith.constant 2 : i32
    return
  }
  func.func @transform_0(%arg0: i32, %arg1: i32, %arg2: i32) -> (i32, i32, i32, i32, i32, i32) {
    %c0_i32 = arith.constant 0 : i32
    %c0_i32_0 = arith.constant 0 : i32
    %c0_i32_1 = arith.constant 0 : i32
    %c0_i32_2 = arith.constant 0 : i32
    return %arg0, %arg1, %arg2, %c0_i32, %c0_i32_0, %c0_i32_1 : i32, i32, i32, i32, i32, i32
  }
  func.func @transform_1(%arg0: i32, %arg1: i32, %arg2: i32) -> (i32, i32, i32, i32) {
    %c0_i32 = arith.constant 0 : i32
    %c0_i32_0 = arith.constant 0 : i32
    return %arg0, %arg1, %arg2, %c0_i32 : i32, i32, i32, i32
  }
}

</mosaic_0001>

<bundles_post_ra>
// kernel: tpu_custom_call.1
= control target key start
LH: loop header
LB: loop body
LE: loop exit
PB: predicated region body
PF: predicated region fallthrough
CT: control target
= control target key end

     0   :  { %6 = vsyncpa [#allocation3], 0  ;;  %s989_s0 = inlined_call_operand.hbm [shape: f32[2,2,3,8,8,32], index: 0, kind: input, shape index: {}]   ;;  %s990_s1 = inlined_call_operand.vmem [shape: f32[2,15,22,32], index: 1, kind: output, shape index: {}]  }
   0x1   :  { %8 = vsyncpa [#allocation3 + $0x1], 0  ;;  %s795_s6 = smov 0   ;;  %s797_s7 = smov 0  }
   0x2   :  { %s799_s8 = smov 0   ;;  %s801_s9 = smov 0  }
   0x3   :  { %s803_s10 = smov 0   ;;  %s805_s11 = smov 0  }
   0x4   :  { %s807_s12 = smov 0   ;;  %s809_s13 = smov 0  }
   0x5 LB: > { %s26_s14 = sadd.s32 1, %s762_s11  ;;  %s33_s15 = sadd.s32 1, %s766_s12  ;;  %s770_s13 = sphi %s809_s13, %s14_s13   ;;  %s766_s12 = sphi %s807_s12, %s1000_s12   ;;  %s762_s11 = sphi %s805_s11, %s999_s11   ;;  %s758_s10 = sphi %s803_s10, %s998_s10   ;;  %s754_s9 = sphi %s801_s9, %s997_s9   ;;  %s750_s8 = sphi %s799_s8, %s996_s8   ;;  %s746_s7 = sphi %s797_s7, %s995_s7   ;;  %s742_s6 = sphi %s795_s6, %s994_s6  }
   0x6   : > { %p27_p0 = scmp.ge.s32.totalorder %s26_s14, 3  ;;  %s539_s16 = sadd.s32 4294967295, %s770_s13  }
   0x7   : > { %p51_p1 = scmp.ne.s32.totalorder %s750_s8, %s746_s7  ;;  %p52_p2 = scmp.eq.s32.totalorder %s770_s13, 0 }
   0x8   : > { %s1002_s14 = smov (%p27_p0, %s26_s14), 0  ;;  %s1004_s15 = smov (!%p27_p0, %s33_s15), %s766_s12 }
   0x9   : > { %s40_s17 = ssub.s32 %s762_s11, %s1002_s14  ;;  %p35_p3 = scmp.ge.s32.totalorder %s1004_s15, 2 }
   0xa   : > { %p57_p4 = scmp.ne.s32.totalorder %s746_s7, %s742_s6  ;;  %p848_p5 = por %p52_p2, %p51_p1 }
   0xb   : > { %p58_p6 = scmp.eq.s32.totalorder %s539_s16, 0  ;;  %s1006_s15 = smov (%p35_p3, %s1004_s15), 0 }
   0xc   : > { %p85_p8 = scmp.eq.s32.totalorder %s539_s16, 5  ;;  %s37_s20 = ssub.s32 %s766_s12, %s1006_s15 }
   0xd   : > { %p854_p7 = por %p58_p6, %p57_p4  ;;  %s44_s21 = sadd.s32 1, %s750_s8 }
   0xe   : > { %s41_s22 = sor.u32 %s40_s17, %s37_s20  ;;  %p864_p9 = por %p85_p8, %p51_p1 }
   0xf   : > { %p42_p10 = scmp.eq.s32.totalorder %s41_s22, 0  ;;  %p542_p11 = scmp.ge.s32.totalorder %s770_s13, 6 }
  0x11   : > { %s869_s24 = scalar_select %p42_p10, %s750_s8, %s44_s21  }
  0x12   : > { %107 = sbr.rel (%p542_p11) target bundleno = 37 (0x25), region = 16 }
  0x17   : > { %s111_s25 = sand.u32 1, %s750_s8   ;;  %s544_s26 = sshll.u32 %s762_s11, 3 }
  0x18   : > { %s543_s27 = sshll.u32 %s111_s25, 7  ;;  %s564_s28 = smul.u32 48, %s766_s12 }
  0x19   : > { %s566_s29 = scalar_select %p848_p5, [#allocation0], [#allocation7] }
  0x1a   : > { %s124_s30 = sadd.s32 %s564_s28, %s544_s26  ;;  %s115_s2 = scalar_lea.vmem [#allocation2], %s543_s27 }
  0x1b   : > { %s139_s3 = sshll.u32 %s115_s2, 4  ;;  %s545_s4 = sshll.u32 %s124_s30, 7  ;;  %s140_s3 = int_to_ptr.vmem [resolvable:$true] %s139_s3 }
  0x1c   : > { %s131_s5 = sld [smem:[%s566_s29]]   ;;  %s126_s17 = scalar_lea.hbm %s989_s0, %s545_s4 }
  0x1d   : > { %s780_s20 = smov 3072   ;;  %s781_s21 = smov 1024  }
  0x1e   : > { %567 = sst [smem:[#allocation6]] (%p848_p5), %s780_s20  ;;  %s782_s22 = smov 8  }
  0x1f   : > { %568 = sst [smem:[#allocation6 + $0x1]] (%p848_p5), %s781_s21  ;;  %s783_s27 = smov 128  }
  0x20   : > { %569 = sst [smem:[#allocation6 + $0x2]] (%p848_p5), %s782_s22  ;;  %s112_s29 = scalar_lea.sflag [#allocation3], %s111_s25 }
  0x21   : > { %570 = sst [smem:[#allocation6 + $0x3]] (%p848_p5), %s783_s27  ;;  %s784_s30 = smov 131072  }
  0x22   : > { %s546_s26 = sshll.u32 %s131_s5, 26  ;;  %571 = sst [smem:[#allocation6 + $0x4]] (%p848_p5), %s783_s27 }
  0x23   : > { %s547_s28 = sadd.s32 134217728, %s546_s26  ;;  %572 = sst [smem:[#allocation6 + $0x5]] (%p848_p5), %s782_s22 }
  0x24   : > { %573 = dma.general (%p848_p5), %s126_s17, 2048, %s140_s3, %s112_s29, %s784_s30, [#allocation6], %s547_s28, 0  }
  0x25 PF: > { %p548_p12 = scmp.ge.s32.totalorder %s770_s13, 1  ;;  %p160_p13 = scmp.lt.s32.totalorder %s770_s13, 7 }
  0x27   : > { %p161_p0 = pnand %p548_p12, %p160_p13 }
  0x28   : > { %s166_s2 = sand.u32 (!%p161_p0), 1, %s746_s7  }
  0x29   : > { %164 = sbr.rel (%p161_p0) target bundleno = 72 (0x48), region = 24  ;;  %s897_s4 = sshll.u32 (!%p161_p0), %s166_s2, 7 }
  0x2a   : > { %s167_s5 = scalar_lea.sflag (!%p161_p0), [#allocation3], %s166_s2  ;;  %s170_s6 = scalar_lea.vmem (!%p161_p0), [#allocation2], %s897_s4 }
  0x2e   : > { %737 = dma.done.wait (%p854_p7), %s167_s5, 2048  }
  0x2f   : > { %739 = vsyncadd (%p854_p7), %s167_s5, 4294965248  ;;  %s905_s18 = scalar_lea.vmem [#allocation4], %s897_s4   ;;  %s772_s25 = smov 0  }
  0x30 LB: >> { %s552_s3 = sshll.u32 %s774_s25, 6  ;;  %vm211_vm0 = vcmask 261120   ;;  %s197_s25 = sadd.s32 1, %s774_s25   ;;  %s774_s25 = sphi %s772_s25, %s197_s25  }
  0x31   : >> { %s200_s16 = scalar_lea.vmem %s170_s6, %s552_s3 [#allocation2]  ;;  %s210_s17 = scalar_lea.vmem %s905_s18, %s552_s3 [#allocation4] }
  0x32   : >> { %v201_v0 = vld [vmem:[%s200_s16] sm:$0xff]  ;;  %v202_v1 = vld [vmem:[%s200_s16 + $0x8] sm:$0xff]  ;;  %v203_v2 = vld [vmem:[%s200_s16 + $0x10] sm:$0xff]  ;;  %p194_p1 = scmp.ge.s32.totalorder %s197_s25, 2  }
  0x33   : >> { %212 = vst.msk [vmem:[%s210_s17] sm:$0xff] %vm211_vm0, %v201_v0  ;;  %213 = vst.msk [vmem:[%s210_s17 + $0x8] sm:$0xff] %vm211_vm0, %v202_v1  ;;  %v204_v3 = vld [vmem:[%s200_s16 + $0x18] sm:$0xff]  ;;  %v205_v4 = vld [vmem:[%s200_s16 + $0x20] sm:$0xff] }
  0x34   : >> { %214 = vst.msk [vmem:[%s210_s17 + $0x10] sm:$0xff] %vm211_vm0, %v203_v2  ;;  %v206_v5 = vld [vmem:[%s200_s16 + $0x28] sm:$0xff]  ;;  %215 = vst.msk [vmem:[%s210_s17 + $0x18] sm:$0xff] %vm211_vm0, %v204_v3  ;;  %v207_v6 = vld [vmem:[%s200_s16 + $0x30] sm:$0xff]  ;;  %196 = sbr.rel (!%p194_p1) target bundleno = 48 (0x30), region = 138 }
  0x35   : >> { %216 = vst.msk [vmem:[%s210_s17 + $0x20] sm:$0xff] %vm211_vm0, %v205_v4  ;;  %217 = vst.msk [vmem:[%s210_s17 + $0x28] sm:$0xff] %vm211_vm0, %v206_v5  ;;  %v208_v7 = vld [vmem:[%s200_s16 + $0x38] sm:$0xff] }
  0x36   : >> { %218 = vst.msk [vmem:[%s210_s17 + $0x30] sm:$0xff] %vm211_vm0, %v207_v6  ;;  %219 = vst.msk [vmem:[%s210_s17 + $0x38] sm:$0xff] %vm211_vm0, %v208_v7 }
  0x39   : > { %226 = sbr.rel (!%p864_p9) target bundleno = 72 (0x48), region = 39  ;;  %s927_s28 = smov (%p864_p9), 0  }
  0x3a   : > { %s565_s19 = smul.u32 (%p864_p9), 45, %s758_s10 }
  0x3c   : > { %s234_s20 = sadd.s32 (%p864_p9), %s754_s9, %s565_s19 }
  0x3d   : > { %s555_s21 = sshll.u32 (%p864_p9), %s234_s20, 3 }
  0x3e   : > { %s925_s27 = scalar_lea.vmem %s990_s1, %s555_s21  }
  0x3f LB: >> { %v332_v8 = vld [vmem:[%s905_s18] sm:$0xff]  ;;  %v334_v9 = vld [vmem:[%s905_s18 + $0x8] sm:$0xff]  ;;  %v336_v10 = vld [vmem:[%s905_s18 + $0x10] sm:$0xff]  ;;  %s326_s28 = sadd.s32 1, %s778_s28   ;;  %s778_s28 = sphi %s927_s28, %s326_s28  }
  0x40   : >> { %333 = vst [vmem:[%s925_s27] sm:$0xff] %v332_v8  ;;  %335 = vst [vmem:[%s925_s27 + $0x18] sm:$0xff] %v334_v9  ;;  %v338_v11 = vld [vmem:[%s905_s18 + $0x18] sm:$0xff]  ;;  %v340_v12 = vld [vmem:[%s905_s18 + $0x20] sm:$0xff]  ;;  %p325_p2 = scmp.ge.s32.totalorder %s326_s28, 1 }
  0x41   : >> { %337 = vst [vmem:[%s925_s27 + $0x30] sm:$0xff] %v336_v10  ;;  %v342_v13 = vld [vmem:[%s905_s18 + $0x28] sm:$0xff]  ;;  %339 = vst [vmem:[%s925_s27 + $0x48] sm:$0xff] %v338_v11  ;;  %v344_v14 = vld [vmem:[%s905_s18 + $0x30] sm:$0xff] }
  0x42   : >> { %341 = vst [vmem:[%s925_s27 + $0x60] sm:$0xff] %v340_v12  ;;  %343 = vst [vmem:[%s925_s27 + $0x78] sm:$0xff] %v342_v13  ;;  %v346_v15 = vld [vmem:[%s905_s18 + $0x38] sm:$0xff]  ;;  %v348_v16 = vld [vmem:[%s905_s18 + $0x40] sm:$0xff] }
  0x43   : >> { %345 = vst [vmem:[%s925_s27 + $0x90] sm:$0xff] %v344_v14  ;;  %347 = vst [vmem:[%s925_s27 + $0xa8] sm:$0xff] %v346_v15  ;;  %v350_v17 = vld [vmem:[%s905_s18 + $0x48] sm:$0xff]  ;;  %v352_v18 = vld [vmem:[%s905_s18 + $0x50] sm:$0xff]  ;;  %328 = sbr.rel (!%p325_p2) target bundleno = 63 (0x3f), region = 149 }
  0x44   : >> { %349 = vst [vmem:[%s925_s27 + $0xc0] sm:$0xff] %v348_v16  ;;  %v354_v19 = vld [vmem:[%s905_s18 + $0x58] sm:$0xff]  ;;  %351 = vst [vmem:[%s925_s27 + $0xd8] sm:$0xff] %v350_v17  ;;  %v356_v20 = vld [vmem:[%s905_s18 + $0x60] sm:$0xff] }
  0x45   : >> { %353 = vst [vmem:[%s925_s27 + $0xf0] sm:$0xff] %v352_v18  ;;  %355 = vst [vmem:[%s925_s27 + $0x108] sm:$0xff] %v354_v19  ;;  %v358_v21 = vld [vmem:[%s905_s18 + $0x68] sm:$0xff]  ;;  %v360_v22 = vld [vmem:[%s905_s18 + $0x70] sm:$0xff] }
  0x46   : >> { %357 = vst [vmem:[%s925_s27 + $0x120] sm:$0xff] %v356_v20  ;;  %359 = vst [vmem:[%s925_s27 + $0x138] sm:$0xff] %v358_v21 }
  0x47   : >> { %361 = vst [vmem:[%s925_s27 + $0x150] sm:$0xff] %v360_v22 }
  0x48 PF: > { %s14_s13 = sadd.s32 1, %s770_s13   ;;  %s994_s6 = smov %s746_s7 }
  0x49   : > { %p11_p3 = scmp.ge.s32.totalorder %s14_s13, 8   ;;  %s995_s7 = smov %s750_s8 }
  0x4a   : > { %s996_s8 = smov %s869_s24  ;;  %s997_s9 = smov %s762_s11 }
  0x4b   : > { %s998_s10 = smov %s766_s12  ;;  %s999_s11 = smov %s1002_s14 }
  0x4c   : > { %s1000_s12 = smov %s1006_s15  ;;  %13 = sbr.rel (!%p11_p3) target bundleno = 5 (0x5), region = 171 }
  0x51   :  { %409 = vsyncpa [#allocation3], 1 }
  0x52   :  { %411 = vsyncpa [#allocation3 + $0x1], 1 }

</bundles_post_ra>
